<compile_context>
chip_gen: v7x
topology: tpu7x:2x2x1
jax: 0.10.0
libtpu: 0.0.40
codegen_flags: <defaults>
</compile_context>

<pallas_src>
import jax
import jax.numpy as jnp
from jax.experimental import pallas as pl
from jax.experimental.pallas import tpu as pltpu

_LANES = 128            # TPU lane width (last-dim tile)
_MAX_TILE_ROWS = 2048   # (2048, 128) f32 block = 1 MiB; ~2 MiB double-buffered
_SMALL_N = 65536        # below this, XLA's native fill already hits roofline


def _round_up(a, b):
    return ((a + b - 1) // b) * b


def _fill_kernel(s_ref, out_ref):
    # s_ref:   SMEM, shape (1,), float32 -- precomputed exp(10 * variance)
    # out_ref: VMEM, (tile_rows, 128) float32 block of the lane-dense slab
    out_ref[...] = jnp.full(out_ref.shape, s_ref[0], dtype=out_ref.dtype)


def single_variance_forward(x, variance, *, force_pallas=False):
    """Pallas equivalent of SingleVarianceNetwork.forward.

    Args:
      x: array whose leading dimension defines the batch size N (values unused).
      variance: scalar (or shape-(1,)) float32 parameter.
      force_pallas: dispatch the Pallas kernel even for small N (testing).

    Returns:
      (N, 1) float32 array filled with exp(variance * 10.0).
    """
    n = int(x.shape[0])
    var = jnp.asarray(variance, dtype=jnp.float32).reshape(())
    s = jnp.exp(var * 10.0)  # hoisted scalar: one EUP/scalar op, done once

    # Small-N fast path: per-pallas_call overhead dwarfs the work; XLA's
    # broadcast-fill is already optimal for this op.
    if n <= _SMALL_N and not force_pallas:
        return jnp.full((n, 1), s, dtype=jnp.float32)

    # Lane-dense padded slab: (rows_padded, 128) f32, tiled along rows.
    rows = pl.cdiv(n, _LANES)
    tile_rows = min(_MAX_TILE_ROWS, _round_up(rows, 8))   # (8,128)-aligned block
    rows_padded = _round_up(rows, tile_rows)
    grid = (rows_padded // tile_rows,)

    slab = pl.pallas_call(
        _fill_kernel,
        out_shape=jax.ShapeDtypeStruct((rows_padded, _LANES), jnp.float32),
        grid=grid,
        in_specs=[pl.BlockSpec(memory_space=pltpu.MemorySpace.SMEM)],
        out_specs=pl.BlockSpec((tile_rows, _LANES), lambda i: (i, 0)),
        compiler_params=pltpu.CompilerParams(
            dimension_semantics=("parallel",),  # 2-TC split on v7x; no-op elsewhere
        ),
    )(s.reshape((1,)))

    # Layout plumbing only: flatten, take first N, present as (N, 1).
    return slab.reshape(-1)[:n].reshape(n, 1)


if __name__ == "__main__":
    key = jax.random.PRNGKey(0)

    # Deterministic parameter init (module __init__ takes init_val; NeuS-style
    # default 0.3).
    init_val = 0.3
    variance = jnp.float32(init_val)

    # Example input: batch of 8 query points with 3 coords (only len(x) matters).
    x = jax.random.normal(key, (8, 3), dtype=jnp.float32)

    # Exercise the Pallas kernel path explicitly (small N would otherwise take
    # the XLA fast path).
    out = single_variance_forward(x, variance, force_pallas=True)
    out = jax.block_until_ready(out)

    # Reference check in plain JAX.
    ref = jnp.ones((x.shape[0], 1), jnp.float32) * jnp.exp(variance * 10.0)
    assert out.shape == (x.shape[0], 1), out.shape
    assert jnp.allclose(out, ref, rtol=1e-6, atol=1e-6), (out, ref)

    # Also verify the small-N fast-path dispatch produces identical results.
    out_fast = jax.block_until_ready(single_variance_forward(x, variance))
    assert out_fast.shape == (x.shape[0], 1), out_fast.shape
    assert jnp.allclose(out_fast, ref, rtol=1e-6, atol=1e-6), (out_fast, ref)

    print("KERNEL_OK")
</pallas_src>

<mosaic_0001>
module attributes {stable_mosaic.version = 11 : i64} {
  func.func @_fill_kernel(%arg0: i32, %arg1: memref<1xf32, #tpu.memory_space<smem>>, %arg2: memref<8x128xf32, #tpu.memory_space<vmem>>) attributes {dimension_semantics = [#tpu.dimension_semantics<parallel>], iteration_bounds = array<i64: 1>, scalar_prefetch = 0 : i64, scratch_operands = 0 : i64, tpu.core_type = #tpu.core_type<tc>, window_params = [{transform_indices = @transform_0, window_bounds = array<i64: 1>}, {transform_indices = @transform_1, window_bounds = array<i64: 8, 128>}]} {
    %c0 = arith.constant 0 : index
    %0 = memref.load %arg1[%c0] : memref<1xf32, #tpu.memory_space<smem>>
    %1 = vector.broadcast %0 : f32 to vector<8x128xf32>
    %c0_0 = arith.constant 0 : index
    %c0_1 = arith.constant 0 : index
    %2 = vector.load %arg2[%c0_0, %c0_1] : memref<8x128xf32, #tpu.memory_space<vmem>>, vector<8x128xf32>
    tpu.vector_store %arg2[%c0_0, %c0_1], %1 {strides = array<i32>} : memref<8x128xf32, #tpu.memory_space<vmem>>, vector<8x128xf32>,
    return
  }
  func.func @transform_0(%arg0: i32) -> i32 {
    %c0_i32 = arith.constant 0 : i32
    %c0_i32_0 = arith.constant 0 : i32
    return %c0_i32 : i32
  }
  func.func @transform_1(%arg0: i32) -> (i32, i32) {
    %c0_i32 = arith.constant 0 : i32
    %c0_i32_0 = arith.constant 0 : i32
    return %arg0, %c0_i32 : i32, i32
  }
}

</mosaic_0001>

<bundles_post_ra>
// kernel: tpu_custom_call.1
= control target key start
LH: loop header
LB: loop body
LE: loop exit
PB: predicated region body
PF: predicated region fallthrough
CT: control target
= control target key end

     0   :  { %s78_s0 = inlined_call_operand.<no memory space> [shape: f32[1], index: 0, kind: input, shape index: {}]   ;;  %s79_s1 = inlined_call_operand.hbm [shape: f32[8,128], index: 1, kind: output, shape index: {}]  }
   0x1   :  { %v11_v0 = vstv %s78_s0 }
   0x2   :  { %7 = vsyncpa [#allocation4], 0  ;;  %12 = vst [vmem:[#allocation3] sm:$0xff] %v11_v0  ;;  %s52_s8 = smov [#allocation3]  }
   0x3   :  { %s19_s9 = sshll.u32 %s52_s8, 4  ;;  %s20_s9 = int_to_ptr.vmem [resolvable:$true] %s19_s9 }
   0x4   :  { %s28_s10 = scalar_lea.vmem %s20_s9, 128  ;;  %p33_p1 = scmp.lt.s32.totalorder %s20_s9, %s20_s9 }
   0x5   :  { %p29_p0 = scmp.ne.s32.totalorder %s20_s9, %s28_s10  ;;  %p34_p2 = scmp.lt.s32.totalorder %s28_s10, %s28_s10 }
   0x7   :  { %p35_p3 = por %p34_p2, %p33_p1 }
   0x9   :  { %p36_p4 = pnand %p35_p3, %p29_p0 }
   0xb   :  { %39 = shalt.err (!%p36_p4)
}
   0xc   :  { %s40_s13 = scalar_lea.hbm %s79_s1, 128 }
   0xd   :  { %p41_p5 = scmp.ne.s32.totalorder %s79_s1, %s40_s13  ;;  %p44_p6 = scmp.lt.u32.totalorder %s40_s13, %s79_s1 }
   0xf   :  { %p46_p7 = pnand %p44_p6, %p41_p5 }
  0x11   :  { %49 = shalt.err (!%p46_p7)
}
  0x12   :  { %22 = dma.vmem_to_hbm [thread:$0]  %s20_s9, 128, %s79_s1, [#allocation4]  }
  0x13   :  { %50 = dma.done.wait [#allocation4], 128  }
  0x14   :  { %51 = vsyncadd [#allocation4], 4294967168 }
  0x15   :  { %26 = vsyncpa [#allocation4], 1 }

</bundles_post_ra>
